<compile_context>
chip_gen: v6e
topology: v6e:2x2x1
jax: 0.10.0
libtpu: 0.0.40
codegen_flags: <defaults>
</compile_context>

<pallas_src>
import functools
import math

import jax
import jax.numpy as jnp
from jax.experimental import pallas as pl
from jax.experimental.pallas import tpu as pltpu

# Safe scoped-VMEM budget on v5e/v6e (128 MiB phys) and v7x (64 MiB phys).
_VMEM_LIMIT = 32 * 1024 * 1024


def _tile(dim, target, quantum):
    """Largest tile <= target that divides `dim` and is a multiple of `quantum`;
    falls back to the full dimension (always a legal BlockSpec block size)."""
    if dim <= target:
        return dim
    t = (target // quantum) * quantum
    while t >= quantum:
        if dim % t == 0:
            return t
        t -= quantum
    return dim


# ---------------------------------------------------------------------------
# Kernel 1: dense layer  y = x @ W + b, tiled over rows and output columns
# ---------------------------------------------------------------------------
def _linear_kernel(x_ref, w_ref, b_ref, o_ref):
    x = x_ref[...].astype(jnp.bfloat16)                              # MXU bf16 peak
    y = jnp.dot(x, w_ref[...], preferred_element_type=jnp.float32)   # f32 accumulate
    o_ref[...] = (y + b_ref[...]).astype(o_ref.dtype)


def linear(x, w, b, out_dtype=None, *, tm=256, tn=512):
    """x: (M, d_in) f32/bf16, w: (d_in, d_out) bf16, b: (1, d_out) f32.

    Row tiles stream through VMEM; the weight is tiled along d_out so even the
    fused (D, 3D) QKV weight never has to be fully VMEM-resident (key for
    v7x's 64 MiB VMEM), and the column axis gives a second "parallel" grid
    dimension for megacore.
    """
    M, d_in = x.shape
    d_out = w.shape[1]
    out_dtype = x.dtype if out_dtype is None else out_dtype
    tm = _tile(M, tm, 8)
    tn = _tile(d_out, tn, 128)
    cost = pl.CostEstimate(
        flops=2 * M * d_in * d_out,
        transcendentals=0,
        bytes_accessed=(M * d_in * x.dtype.itemsize
                        + d_in * d_out * w.dtype.itemsize
                        + d_out * b.dtype.itemsize
                        + M * d_out * jnp.dtype(out_dtype).itemsize),
    )
    return pl.pallas_call(
        _linear_kernel,
        out_shape=jax.ShapeDtypeStruct((M, d_out), out_dtype),
        grid=(M // tm, d_out // tn),
        in_specs=[
            pl.BlockSpec((tm, d_in), lambda i, j: (i, 0)),   # streamed row tiles
            pl.BlockSpec((d_in, tn), lambda i, j: (0, j)),   # streamed weight columns
            pl.BlockSpec((1, tn), lambda i, j: (0, j)),      # bias columns
        ],
        out_specs=pl.BlockSpec((tm, tn), lambda i, j: (i, j)),
        compiler_params=pltpu.CompilerParams(
            dimension_semantics=("parallel", "parallel"),
            vmem_limit_bytes=_VMEM_LIMIT),
        cost_estimate=cost,
    )(x, w, b)


# ---------------------------------------------------------------------------
# Kernel 2: flash-style multi-head attention (online softmax, KV streaming)
# ---------------------------------------------------------------------------
def _flash_attn_kernel(q_ref, k_ref, v_ref, o_ref, m_sc, l_sc, acc_sc, *, n_heads):
    """One (batch, q-tile, kv-tile) grid step.

    q_ref: (1, Tq, D) bf16, already scaled by 1/sqrt(Dh) (folded into W_q).
    k_ref, v_ref: (1, Tk, D) bf16.  Heads are contiguous lane slices of D.
    Scratch: m/l (H, Tq, 1) f32 running max/denominator, acc (Tq, D) f32.
    """
    ki = pl.program_id(2)

    @pl.when(ki == 0)
    def _():
        m_sc[...] = jnp.full_like(m_sc, -jnp.inf)
        l_sc[...] = jnp.zeros_like(l_sc)
        acc_sc[...] = jnp.zeros_like(acc_sc)

    q = q_ref[0]                      # (Tq, D) bf16, pre-scaled
    k = k_ref[0]                      # (Tk, D) bf16
    v = v_ref[0]                      # (Tk, D) bf16
    D = q.shape[-1]
    Dh = D // n_heads
    # Contract the last dims directly: no .T -> no per-head XLU transpose.
    dn = (((1,), (1,)), ((), ()))

    # TODO(synk): when Dh < 128 these lane slices are not register-aligned; a
    # batched (H, Tq, Dh) layout (pltpu.einshape) or Dh padding would remove
    # the per-head relayouts.  At Dh == 128 (typical production) they align.
    for h in range(n_heads):
        lo, hi = h * Dh, (h + 1) * Dh
        s = jax.lax.dot_general(q[:, lo:hi], k[:, lo:hi], dn,
                                preferred_element_type=jnp.float32)   # (Tq, Tk) f32
        m_prev = m_sc[h]                                              # (Tq, 1)
        m_new = jnp.maximum(m_prev, jnp.max(s, axis=-1, keepdims=True))
        alpha = jnp.exp(m_prev - m_new)
        # NOTE: this exp stream (H * S^2 per batch element) is the binding EUP
        # slot on v6e/v7x for Dh <~ 256; the matmuls hide under it.
        p = jnp.exp(s - m_new)                                        # f32 softmax math
        l_sc[h] = alpha * l_sc[h] + jnp.sum(p, axis=-1, keepdims=True)
        pv = jnp.dot(p.astype(v.dtype), v[:, lo:hi],
                     preferred_element_type=jnp.float32)              # (Tq, Dh)
        acc_sc[:, lo:hi] = alpha * acc_sc[:, lo:hi] + pv              # bounded live range
        m_sc[h] = m_new

    @pl.when(ki == pl.num_programs(2) - 1)
    def _():
        # Exact per-head normalization: runs once per (b, q-tile); cost hidden
        # under the exp stream and keeps closer parity than approx reciprocal.
        for h in range(n_heads):
            lo, hi = h * Dh, (h + 1) * Dh
            acc_sc[:, lo:hi] = acc_sc[:, lo:hi] / l_sc[h]
        o_ref[0] = acc_sc[...].astype(o_ref.dtype)   # single lane-dense (Tq, D) store


def _attention_call(inputs, in_specs, *, B, S, D, n_heads, Tq, Tk, out_dtype):
    cost = pl.CostEstimate(
        flops=4 * B * S * S * D,              # QK^T + PV over all heads
        transcendentals=B * n_heads * S * S,  # exp
        bytes_accessed=8 * B * S * D)         # bf16 q,k,v in + bf16 out
    return pl.pallas_call(
        functools.partial(_flash_attn_kernel, n_heads=n_heads),
        out_shape=jax.ShapeDtypeStruct((B, S, D), out_dtype),
        grid_spec=pltpu.PrefetchScalarGridSpec(
            num_scalar_prefetch=0,
            grid=(B, S // Tq, S // Tk),
            in_specs=in_specs,
            out_specs=pl.BlockSpec((1, Tq, D), lambda b, qi, ki: (b, qi, 0)),
            scratch_shapes=[
                pltpu.VMEM((n_heads, Tq, 1), jnp.float32),   # running max
                pltpu.VMEM((n_heads, Tq, 1), jnp.float32),   # running denominator
                pltpu.VMEM((Tq, D), jnp.float32),            # output accumulator
            ]),
        compiler_params=pltpu.CompilerParams(
            dimension_semantics=("parallel", "parallel", "arbitrary"),
            vmem_limit_bytes=_VMEM_LIMIT),
        cost_estimate=cost,
    )(*inputs)


def flash_attention(q, k, v, n_heads, *, tq=256, tk=512):
    """q, k, v: (B, S, D) bf16 (q pre-scaled by 1/sqrt(Dh)) -> (B, S, D) bf16."""
    B, S, D = q.shape
    Tq = _tile(S, tq, 8)
    Tk = _tile(S, tk, 128)
    specs = [
        pl.BlockSpec((1, Tq, D), lambda b, qi, ki: (b, qi, 0)),
        pl.BlockSpec((1, Tk, D), lambda b, qi, ki: (b, ki, 0)),
        pl.BlockSpec((1, Tk, D), lambda b, qi, ki: (b, ki, 0)),
    ]
    return _attention_call((q, k, v), specs, B=B, S=S, D=D, n_heads=n_heads,
                           Tq=Tq, Tk=Tk, out_dtype=q.dtype)


def flash_attention_packed(qkv, n_heads, *, tq=256, tk=512):
    """qkv: (B, S, 3D) bf16 with q|k|v concatenated on lanes (q pre-scaled).

    q/k/v tiles are read straight out of the packed activation via last-axis
    block indices 0/1/2 (zero extra HBM passes).  Requires D % 128 == 0 so
    each D-wide lane block is register-aligned.
    """
    B, S, D3 = qkv.shape
    D = D3 // 3
    assert D % 128 == 0
    Tq = _tile(S, tq, 8)
    Tk = _tile(S, tk, 128)
    specs = [
        pl.BlockSpec((1, Tq, D), lambda b, qi, ki: (b, qi, 0)),
        pl.BlockSpec((1, Tk, D), lambda b, qi, ki: (b, ki, 1)),
        pl.BlockSpec((1, Tk, D), lambda b, qi, ki: (b, ki, 2)),
    ]
    return _attention_call((qkv, qkv, qkv), specs, B=B, S=S, D=D, n_heads=n_heads,
                           Tq=Tq, Tk=Tk, out_dtype=qkv.dtype)


# ---------------------------------------------------------------------------
# Module wrapper
# ---------------------------------------------------------------------------
class MultiHeadAttentionPallas:
    def __init__(self, d_model, n_heads, dropout, key):
        assert d_model % n_heads == 0
        self.d_model = d_model
        self.n_heads = n_heads
        self.head_dim = d_model // n_heads
        self.dropout = dropout  # identity at inference

        keys = jax.random.split(key, 8)
        bound = 1.0 / math.sqrt(d_model)

        def init_linear(kw, kb):
            # PyTorch nn.Linear: weight (out,in) ~ U(-bound, bound); stored (in,out).
            w = jax.random.uniform(kw, (d_model, d_model), jnp.float32, -bound, bound)
            b = jax.random.uniform(kb, (1, d_model), jnp.float32, -bound, bound)
            return w, b

        # f32 master parameters (used by the pure-JAX reference).
        self.wq, self.bq = init_linear(keys[0], keys[1])
        self.wk, self.bk = init_linear(keys[2], keys[3])
        self.wv, self.bv = init_linear(keys[4], keys[5])
        self.wo, self.bo = init_linear(keys[6], keys[7])

        # Kernel weights: bf16 (MXU peak / half HBM traffic), with the 1/sqrt(Dh)
        # softmax scale folded into the q projection (free, done once at init).
        scale = 1.0 / math.sqrt(self.head_dim)
        self.wq_k = (self.wq * scale).astype(jnp.bfloat16)
        self.bq_k = self.bq * scale
        self.wk_k = self.wk.astype(jnp.bfloat16)
        self.wv_k = self.wv.astype(jnp.bfloat16)
        self.wo_k = self.wo.astype(jnp.bfloat16)

        # Fused q|k|v weights for the self-attention fast path.
        self.w_qkv = jnp.concatenate([self.wq_k, self.wk_k, self.wv_k], axis=1)
        self.b_qkv = jnp.concatenate([self.bq_k, self.bk, self.bv], axis=1)

    def __call__(self, query, key, value, mask=None):
        assert mask is None  # TODO(synk): masked attention path not implemented
        B, S, D = query.shape
        same = (query is key) and (query is value)

        if same and D % 128 == 0:
            # Self-attention fast path: one fused (D, 3D) projection; attention
            # reads q/k/v lane-blocks directly from the packed bf16 activation.
            qkv = linear(query.reshape(B * S, D), self.w_qkv, self.b_qkv,
                         jnp.bfloat16)
            o = flash_attention_packed(qkv.reshape(B, S, 3 * D), self.n_heads)
        else:
            # General / cross-attention path: three row+column tiled projections.
            q = linear(query.reshape(B * S, D), self.wq_k, self.bq_k,
                       jnp.bfloat16).reshape(B, S, D)
            k = linear(key.reshape(B * S, D), self.wk_k, self.bk,
                       jnp.bfloat16).reshape(B, S, D)
            v = linear(value.reshape(B * S, D), self.wv_k, self.bv,
                       jnp.bfloat16).reshape(B, S, D)
            o = flash_attention(q, k, v, self.n_heads)

        # Heads were merged on lanes inside the attention kernel: no transposes.
        out = linear(o.reshape(B * S, D), self.wo_k, self.bo, jnp.float32)
        return out.reshape(B, S, D)


# ---------------------------------------------------------------------------
# Pure-JAX f32 reference (mirrors the PyTorch forward)
# ---------------------------------------------------------------------------
def reference(mha, query, key, value):
    B, S, D = query.shape
    H, Dh = mha.n_heads, mha.head_dim
    q = (query.reshape(B * S, D) @ mha.wq + mha.bq).reshape(B, S, H, Dh).transpose(0, 2, 1, 3)
    k = (key.reshape(B * S, D) @ mha.wk + mha.bk).reshape(B, S, H, Dh).transpose(0, 2, 1, 3)
    v = (value.reshape(B * S, D) @ mha.wv + mha.bv).reshape(B, S, H, Dh).transpose(0, 2, 1, 3)
    s = jnp.einsum("bhqd,bhkd->bhqk", q, k) / math.sqrt(Dh)
    p = jax.nn.softmax(s, axis=-1)
    o = jnp.einsum("bhqk,bhkd->bhqd", p, v).transpose(0, 2, 1, 3).reshape(B * S, D)
    return (o @ mha.wo + mha.bo).reshape(B, S, D)


if __name__ == "__main__":
    B, S, D, H = 2, 16, 32, 4
    root = jax.random.PRNGKey(0)
    k_param, k_q, k_k, k_v, k_param2, k_x2 = jax.random.split(root, 6)

    mha = MultiHeadAttentionPallas(d_model=D, n_heads=H, dropout=0.1, key=k_param)

    query = jax.random.normal(k_q, (B, S, D), jnp.float32)
    key_ = jax.random.normal(k_k, (B, S, D), jnp.float32)
    value = jax.random.normal(k_v, (B, S, D), jnp.float32)

    # Cross-attention path (distinct q/k/v inputs).
    out = jax.block_until_ready(mha(query, key_, value))
    ref = reference(mha, query, key_, value)
    assert out.shape == (B, S, D)
    assert jnp.allclose(out, ref, atol=5e-2, rtol=5e-2), \
        float(jnp.max(jnp.abs(out - ref)))

    # Self-attention, general path (D=32 is not lane-aligned for the packed read).
    out_sa = jax.block_until_ready(mha(query, query, query))
    ref_sa = reference(mha, query, query, query)
    assert jnp.allclose(out_sa, ref_sa, atol=5e-2, rtol=5e-2), \
        float(jnp.max(jnp.abs(out_sa - ref_sa)))

    # Self-attention fast path: fused QKV projection + packed attention read
    # (requires D % 128 == 0).
    B2, S2, D2, H2 = 1, 16, 128, 2
    mha2 = MultiHeadAttentionPallas(d_model=D2, n_heads=H2, dropout=0.0, key=k_param2)
    x2 = jax.random.normal(k_x2, (B2, S2, D2), jnp.float32)
    out2 = jax.block_until_ready(mha2(x2, x2, x2))
    ref2 = reference(mha2, x2, x2, x2)
    assert out2.shape == (B2, S2, D2)
    assert jnp.allclose(out2, ref2, atol=5e-2, rtol=5e-2), \
        float(jnp.max(jnp.abs(out2 - ref2)))

    print("KERNEL_OK")
</pallas_src>

<mosaic_0001>
module attributes {stable_mosaic.version = 11 : i64} {
  func.func @_linear_kernel(%arg0: i32, %arg1: i32, %arg2: memref<32x32xf32, #tpu.memory_space<vmem>>, %arg3: memref<32x32xbf16, #tpu.memory_space<vmem>>, %arg4: memref<1x32xf32, #tpu.memory_space<vmem>>, %arg5: memref<32x32xbf16, #tpu.memory_space<vmem>>) attributes {dimension_semantics = [#tpu.dimension_semantics<parallel>, #tpu.dimension_semantics<parallel>], iteration_bounds = array<i64: 1, 1>, scalar_prefetch = 0 : i64, scratch_operands = 0 : i64, tpu.core_type = #tpu.core_type<tc>, window_params = [{transform_indices = @transform_0, window_bounds = array<i64: 32, 32>}, {transform_indices = @transform_1, window_bounds = array<i64: 32, 32>}, {transform_indices = @transform_2, window_bounds = array<i64: 1, 32>}, {transform_indices = @transform_3, window_bounds = array<i64: 32, 32>}]} {
    %c0 = arith.constant 0 : index
    %c0_0 = arith.constant 0 : index
    %0 = vector.load %arg2[%c0, %c0_0] : memref<32x32xf32, #tpu.memory_space<vmem>>, vector<32x32xf32>
    %1 = arith.truncf %0 : vector<32x32xf32> to vector<32x32xbf16>
    %c0_1 = arith.constant 0 : index
    %c0_2 = arith.constant 0 : index
    %2 = vector.load %arg3[%c0_1, %c0_2] : memref<32x32xbf16, #tpu.memory_space<vmem>>, vector<32x32xbf16>
    %cst = arith.constant dense<0.000000e+00> : vector<32x32xf32>
    %3 = tpu.matmul %1, %2, %cst {dimension_numbers = #tpu.dot_dimension_numbers<[1], [0], [0], [1], [0, 0, 1, 1], [], []>} : vector<32x32xbf16>, vector<32x32xbf16>, vector<32x32xf32> -> vector<32x32xf32>
    %c0_3 = arith.constant 0 : index
    %c0_4 = arith.constant 0 : index
    %4 = vector.load %arg4[%c0_3, %c0_4] : memref<1x32xf32, #tpu.memory_space<vmem>>, vector<1x32xf32>
    %5 = vector.broadcast %4 : vector<1x32xf32> to vector<32x32xf32>
    %6 = arith.addf %3, %5 : vector<32x32xf32>
    %7 = arith.truncf %6 : vector<32x32xf32> to vector<32x32xbf16>
    %c0_5 = arith.constant 0 : index
    %c0_6 = arith.constant 0 : index
    %8 = vector.load %arg5[%c0_5, %c0_6] : memref<32x32xbf16, #tpu.memory_space<vmem>>, vector<32x32xbf16>
    tpu.vector_store %arg5[%c0_5, %c0_6], %7 {strides = array<i32>} : memref<32x32xbf16, #tpu.memory_space<vmem>>, vector<32x32xbf16>,
    return
  }
  func.func @transform_0(%arg0: i32, %arg1: i32) -> (i32, i32) {
    %c0_i32 = arith.constant 0 : i32
    %c0_i32_0 = arith.constant 0 : i32
    return %arg0, %c0_i32 : i32, i32
  }
  func.func @transform_1(%arg0: i32, %arg1: i32) -> (i32, i32) {
    %c0_i32 = arith.constant 0 : i32
    %c0_i32_0 = arith.constant 0 : i32
    return %c0_i32, %arg1 : i32, i32
  }
  func.func @transform_2(%arg0: i32, %arg1: i32) -> (i32, i32) {
    %c0_i32 = arith.constant 0 : i32
    %c0_i32_0 = arith.constant 0 : i32
    return %c0_i32, %arg1 : i32, i32
  }
  func.func @transform_3(%arg0: i32, %arg1: i32) -> (i32, i32) {
    %c0_i32 = arith.constant 0 : i32
    return %arg0, %arg1 : i32, i32
  }
}

</mosaic_0001>

<bundles_post_ra>
// kernel: tpu_custom_call.1
= control target key start
LH: loop header
LB: loop body
LE: loop exit
PB: predicated region body
PF: predicated region fallthrough
CT: control target
= control target key end

     0   :  { %8 = vsyncpa [#allocation3], 0  ;;  %s317_s0 = inlined_call_operand.hbm [shape: f32[32,32], index: 0, kind: input, shape index: {}]   ;;  %s318_s1 = inlined_call_operand.hbm [shape: bf16[32,32], index: 1, kind: input, shape index: {}]   ;;  %s319_s2 = inlined_call_operand.vmem [shape: f32[1,32], index: 2, kind: input, shape index: {}]   ;;  %s320_s3 = inlined_call_operand.hbm [shape: bf16[32,32], index: 3, kind: output, shape index: {}]  }
   0x1   :  { %9 = vsyncpa [#allocation6], 0 }
   0x2   :  { %10 = vsyncpa [#allocation4], 0  ;;  %s268_s12 = smov [#allocation2]  }
   0x3   :  { %s16_s13 = sshll.u32 %s268_s12, 4  ;;  %s17_s13 = int_to_ptr.vmem [resolvable:$true] %s16_s13 }
   0x4   :  { %s210_s14 = scalar_lea.vmem %s17_s13, 512  ;;  %p215_p1 = scmp.lt.s32.totalorder %s17_s13, %s17_s13 }
   0x5   :  { %p211_p0 = scmp.ne.s32.totalorder %s17_s13, %s210_s14  ;;  %p216_p2 = scmp.lt.s32.totalorder %s210_s14, %s210_s14 }
   0x7   :  { %p217_p3 = por %p216_p2, %p215_p1 }
   0x9   :  { %p218_p4 = pnand %p217_p3, %p211_p0 }
   0xb   :  { %221 = shalt.err (!%p218_p4)
}
   0xc   :  { %s269_s15 = smov 128   ;;  %s270_s16 = smov 8  }
   0xd   :  { %22 = dma.hbm_to_vmem [thread:$0]  %s317_s0, 512, %s17_s13, [#allocation3], %s269_s15, %s269_s15, %s270_s16  }
   0xe   :  { %s271_s19 = smov [#allocation5]  }
   0xf   :  { %s28_s20 = sshll.u32 %s271_s19, 4  ;;  %s29_s20 = int_to_ptr.vmem [resolvable:$true] %s28_s20 }
  0x10   :  { %s230_s21 = scalar_lea.vmem %s29_s20, 256  ;;  %p235_p6 = scmp.lt.s32.totalorder %s29_s20, %s29_s20 }
  0x11   :  { %p231_p5 = scmp.ne.s32.totalorder %s29_s20, %s230_s21  ;;  %p236_p7 = scmp.lt.s32.totalorder %s230_s21, %s230_s21 }
  0x13   :  { %p237_p8 = por %p236_p7, %p235_p6 }
  0x15   :  { %p238_p9 = pnand %p237_p8, %p231_p5 }
  0x17   :  { %241 = shalt.err (!%p238_p9)
}
  0x18   :  { %s272_s22 = smov 64   ;;  %s273_s23 = smov 4  }
  0x19   :  { %34 = dma.hbm_to_vmem [thread:$0]  %s318_s1, 256, %s29_s20, [#allocation6], %s272_s22, %s272_s22, %s273_s23  }
  0x1a   :  { %262 = dma.done.wait [#allocation3], 512  }
  0x1b   :  { %263 = vsyncadd [#allocation3], 4294966784 }
  0x1c   :  { %264 = dma.done.wait [#allocation6], 256  }
  0x1d   :  { %265 = vsyncadd [#allocation6], 4294967040  ;;  %v200_v0 = vld [vmem:[#allocation5 + $0x8] sm:$0xff]   ;;  %v201_v1 = vld [vmem:[#allocation5] sm:$0xff]   ;;  %vm73_vm0 = vcmask 261120   ;;  %vm145_vm1 = vcmask 257024  }
  0x1e   :  { %185 = vmatprep.subr.bf16.mxu0 %v200_v0  ;;  %v44_v2 = vld [vmem:[#allocation2] sm:$0xff]  ;;  %v45_v3 = vld [vmem:[#allocation2 + $0x8] sm:$0xff]  ;;  %v46_v5 = vld [vmem:[#allocation2 + $0x10] sm:$0xff]  ;;  %s274_s26 = smov [#allocation7]  }
  0x1f   :  { %186 = vmatpush3.bf16.msra.mxu0 %v200_v0  ;;  %v48_v4 = vpack.c.bf16 %v45_v3, %v44_v2  ;;  %v47_v6 = vld [vmem:[#allocation2 + $0x18] sm:$0xff]  ;;  %v168_v8 = vld [vmem:[%s319_s2] ss:$0 sm:$0xff]  ;;  %s155_s27 = sshll.u32 %s274_s26, 4  ;;  %s156_s27 = int_to_ptr.vmem [resolvable:$true] %s155_s27 }
  0x20   :  { %187 = vmatprep.subr.bf16.mxu0 %v201_v1  ;;  %v49_v7 = vpack.c.bf16 %v47_v6, %v46_v5  ;;  %s242_s2 = scalar_lea.vmem %s156_s27, 256  ;;  %p247_p11 = scmp.lt.s32.totalorder %s156_s27, %s156_s27 }
  0x21   :  { %189 = vmatprep.mubr.msk.bf16.mxu0 %vm73_vm0, %v48_v4  ;;  %p243_p10 = scmp.ne.s32.totalorder %s156_s27, %s242_s2  ;;  %p248_p12 = scmp.lt.s32.totalorder %s242_s2, %s242_s2 }
  0x23   :  { %188 = vmatpush3.bf16.msra.mxu0 %v201_v1  ;;  %p249_p13 = por %p248_p12, %p247_p11 }
  0x25   :  { %p250_p0 = pnand %p249_p13, %p243_p10 }
  0x26   :  { %190 = vmatmul.mubr.msk.bf16.vlgmr.msra.gmra.mxu0 %vm73_vm0, %v49_v7 }
  0xe6   :  { %v191_v9 = vpop.f32.mrf.mxu0 }
  0xe7   :  { %v123_v10 = vadd.f32 %v191_v9, %v168_v8 }
  0xe8   :  { %v114_v11 = vpop.f32.mrf.mxu0 }
  0xe9   :  { %v179_v12 = vpack.c.bf16 %v123_v10, %v123_v10  ;;  %v115_v13 = vadd.f32 %v168_v8, %v114_v11 }
  0xea   :  { %v192_v14 = vpop.f32.mrf.mxu0 }
  0xeb   :  { %148 = vst.msk [vmem:[#allocation7 + $0x8] sm:$0xf] %vm145_vm1, %v179_v12  ;;  %v177_v15 = vpack.c.bf16 %v115_v13, %v115_v13  ;;  %v126_v16 = vadd.f32 %v192_v14, %v168_v8 }
  0xec   :  { %v117_v17 = vpop.f32.mrf.mxu0 }
  0xed   :  { %146 = vst.msk [vmem:[#allocation7] sm:$0xf] %vm145_vm1, %v177_v15  ;;  %v180_v18 = vpack.c.bf16 %v126_v16, %v126_v16  ;;  %v118_v19 = vadd.f32 %v168_v8, %v117_v17 }
  0xef   :  { %149 = vst.msk [vmem:[#allocation7 + $0xc] sm:$0xf] %vm145_vm1, %v180_v18  ;;  %v178_v20 = vpack.c.bf16 %v118_v19, %v118_v19 }
  0xf1   :  { %147 = vst.msk [vmem:[#allocation7 + $0x4] sm:$0xf] %vm145_vm1, %v178_v20 }
  0xf2   :  { %253 = shalt.err (!%p250_p0)
}
  0xf3   :  { %161 = dma.vmem_to_hbm [thread:$0]  %s156_s27, 256, %s320_s3, [#allocation4], %s272_s22, %s272_s22, %s273_s23  }
  0xf4   :  { %266 = dma.done.wait [#allocation4], 256  }
  0xf5   :  { %267 = vsyncadd [#allocation4], 4294967040 }
  0xf6   :  { %165 = vsyncpa [#allocation3], 1 }
  0xf7   :  { %166 = vsyncpa [#allocation6], 1 }
  0xf8   :  { %167 = vsyncpa [#allocation4], 1 }

</bundles_post_ra>
